<compile_context>
chip_gen: v6e
topology: v6e:2x2x1
jax: 0.10.0
libtpu: 0.0.40
codegen_flags: <defaults>
</compile_context>

<pallas_src>
import functools

import jax
import jax.numpy as jnp
from jax import lax
from jax.experimental import pallas as pl
from jax.experimental.pallas import tpu as pltpu

EPS = 1e-8  # torch.nn.functional.cosine_similarity default eps


def _dissim_kernel(z_ref, za_ref, inv_a_ref, mask_ref, out_ref, acc_ref, *,
                   inv_count):
    pid = pl.program_id(0)

    @pl.when(pid == 0)
    def _():
        acc_ref[0, 0] = jnp.float32(0.0)

    z = z_ref[...]        # (ROW_BLK, D)  rows of the stacked (P*B, D) matrix
    za = za_ref[...]      # (B, D)        z_avg (resident)

    # One fused MXU matmul contracting the feature dim:
    #   dots[r, k] = z[r] . z_avg[k]
    dots = lax.dot_general(
        z, za,
        dimension_numbers=(((1,), (1,)), ((), ())),
        preferred_element_type=jnp.float32)            # (ROW_BLK, B)

    # EUP rsqrt instead of sqrt + divide.  cosine = dots / max(|z||za|, eps)
    # == dots * min(inv_z * inv_a, 1/eps)  (exact for non-negative norms).
    inv_z = lax.rsqrt(jnp.sum(z * z, axis=-1, keepdims=True))      # (ROW_BLK, 1)
    inv = jnp.minimum(inv_z * inv_a_ref[...], jnp.float32(1.0 / EPS))

    # Off-diagonal (j != k) sum via a precomputed 0/1 mask; no iota/select.
    acc_ref[0, 0] += jnp.sum(dots * inv * mask_ref[...])

    @pl.when(pid == pl.num_programs(0) - 1)
    def _():
        # sum_{j!=k}(cos - 1)/count  ==  sum_offdiag(cos)/count - 1
        out_ref[0, 0] = acc_ref[0, 0] * jnp.float32(inv_count) - jnp.float32(1.0)


def _pick_p_blk(P, B, D, target_bytes=4 << 20):
    """Largest divisor of P whose (p_blk*B, D) f32 block fits the target and
    keeps the sublane dim a multiple of 8 (or covers the whole array)."""
    cands = [c for c in range(1, P + 1)
             if P % c == 0 and ((c * B) % 8 == 0 or c == P)]
    fitting = [c for c in cands if c * B * D * 4 <= target_bytes]
    return max(fitting) if fitting else min(cands)


def dissimilarity_loss(z_list, z_avg=None, *, p_blk=None):
    """JAX/Pallas equivalent of DisSimilarity_Loss.forward(z_list, z_avg).

    z_list: sequence of P arrays of shape (B, D).
    z_avg:  ignored (the reference recomputes it); kept for signature parity.
    """
    z = jnp.stack(list(z_list), axis=0).astype(jnp.float32)      # (P, B, D)
    P, B, D = z.shape
    if p_blk is None:
        p_blk = _pick_p_blk(P, B, D)
    assert P % p_blk == 0
    row_blk = p_blk * B
    n_blk = (P * B) // row_blk

    z2d = z.reshape(P * B, D)                                    # free reshape
    za = jnp.mean(z, axis=0)                                     # (B, D)
    inv_a = lax.rsqrt(jnp.sum(za * za, axis=-1, keepdims=True)).T  # (1, B)
    # Off-diagonal mask for one row-block; identical for every block because
    # every block start is a multiple of B.
    mask = jnp.tile(1.0 - jnp.eye(B, dtype=jnp.float32), (p_blk, 1))  # (row_blk, B)

    inv_count = 1.0 / float(P * B * (B - 1))
    kernel = functools.partial(_dissim_kernel, inv_count=inv_count)

    out = pl.pallas_call(
        kernel,
        grid=(n_blk,),
        in_specs=[
            pl.BlockSpec((row_blk, D), lambda i: (i, 0)),   # streamed z rows
            pl.BlockSpec((B, D), lambda i: (0, 0)),         # z_avg (resident)
            pl.BlockSpec((1, B), lambda i: (0, 0)),         # 1/||z_avg||
            pl.BlockSpec((row_blk, B), lambda i: (0, 0)),   # off-diag mask
        ],
        out_specs=pl.BlockSpec((1, 1), lambda i: (0, 0),
                               memory_space=pltpu.MemorySpace.SMEM),
        out_shape=jax.ShapeDtypeStruct((1, 1), jnp.float32),
        scratch_shapes=[pltpu.SMEM((1, 1), jnp.float32)],
        compiler_params=pltpu.CompilerParams(
            dimension_semantics=("arbitrary",),          # reduction axis
            vmem_limit_bytes=32 * 1024 * 1024),
    )(z2d, za, inv_a, mask)
    return out[0, 0]


def _reference(z_list):
    # Pure-JAX reference of the PyTorch semantics (elementwise dots so the
    # check is independent of XLA matmul precision defaults).
    z = jnp.stack(list(z_list), axis=0).astype(jnp.float32)      # (P, B, D)
    P, B, _ = z.shape
    za = jnp.mean(z, axis=0)
    dots = jnp.sum(z[:, :, None, :] * za[None, None, :, :], axis=-1)  # (P,B,B)
    nz = jnp.sqrt(jnp.sum(z * z, axis=-1))
    na = jnp.sqrt(jnp.sum(za * za, axis=-1))
    cos = dots / jnp.maximum(nz[:, :, None] * na[None, None, :], EPS)
    mask = ~jnp.eye(B, dtype=bool)[None, :, :]
    return jnp.sum(jnp.where(mask, cos - 1.0, 0.0)) / (P * B * (B - 1))


if __name__ == "__main__":
    P, B, D = 8, 8, 32
    key = jax.random.PRNGKey(0)
    keys = jax.random.split(key, P + 1)
    z_list = [jax.random.normal(keys[i], (B, D), dtype=jnp.float32)
              for i in range(P)]
    # z_avg argument is unused by the reference forward; pass something anyway.
    z_avg_arg = jax.random.normal(keys[P], (B, D), dtype=jnp.float32)

    # p_blk=2 -> grid of 4 row-blocks, exercising the pipelined accumulator.
    out = dissimilarity_loss(z_list, z_avg_arg, p_blk=2)
    out = jax.block_until_ready(out)

    ref = jax.block_until_ready(_reference(z_list))
    assert jnp.allclose(out, ref, atol=1e-4, rtol=1e-4), (float(out), float(ref))

    print("KERNEL_OK")
</pallas_src>

<mosaic_0001>
module attributes {stable_mosaic.version = 11 : i64} {
  func.func @_dissim_kernel(%arg0: i32, %arg1: memref<16x32xf32, #tpu.memory_space<vmem>>, %arg2: memref<8x32xf32, #tpu.memory_space<vmem>>, %arg3: memref<1x8xf32, #tpu.memory_space<vmem>>, %arg4: memref<16x8xf32, #tpu.memory_space<vmem>>, %arg5: memref<1x1xf32, #tpu.memory_space<smem>>, %arg6: memref<1x1xf32, #tpu.memory_space<smem>>) attributes {dimension_semantics = [#tpu.dimension_semantics<arbitrary>], iteration_bounds = array<i64: 4>, scalar_prefetch = 0 : i64, scratch_operands = 1 : i64, tpu.core_type = #tpu.core_type<tc>, window_params = [{transform_indices = @transform_0, window_bounds = array<i64: 16, 32>}, {pipeline_mode = #tpu.pipeline_mode<synchronous>, transform_indices = @transform_1, window_bounds = array<i64: 8, 32>}, {pipeline_mode = #tpu.pipeline_mode<synchronous>, transform_indices = @transform_2, window_bounds = array<i64: 1, 8>}, {pipeline_mode = #tpu.pipeline_mode<synchronous>, transform_indices = @transform_3, window_bounds = array<i64: 16, 8>}, {transform_indices = @transform_4, window_bounds = array<i64: 1, 1>}]} {
    %c0_i32 = arith.constant 0 : i32
    %0 = arith.cmpi eq, %arg0, %c0_i32 : i32
    %1 = arith.extui %0 : i1 to i32
    %c0_i32_0 = arith.constant 0 : i32
    %2 = arith.cmpi ne, %1, %c0_i32_0 : i32
    scf.if %2 {
      %cst_16 = arith.constant 0.000000e+00 : f32
      %c0_17 = arith.constant 0 : index
      %c0_18 = arith.constant 0 : index
      %29 = memref.load %arg6[%c0_17, %c0_18] : memref<1x1xf32, #tpu.memory_space<smem>>
      memref.store %cst_16, %arg6[%c0_17, %c0_18] : memref<1x1xf32, #tpu.memory_space<smem>>
    } else {
    }
    %c0 = arith.constant 0 : index
    %c0_1 = arith.constant 0 : index
    %3 = vector.load %arg1[%c0, %c0_1] : memref<16x32xf32, #tpu.memory_space<vmem>>, vector<16x32xf32>
    %c0_2 = arith.constant 0 : index
    %c0_3 = arith.constant 0 : index
    %4 = vector.load %arg2[%c0_2, %c0_3] : memref<8x32xf32, #tpu.memory_space<vmem>>, vector<8x32xf32>
    %cst = arith.constant dense<0.000000e+00> : vector<16x8xf32>
    %5 = tpu.matmul %3, %4, %cst {dimension_numbers = #tpu.dot_dimension_numbers<[1], [1], [0], [0], [0, 0, 1, 0], [], []>} : vector<16x32xf32>, vector<8x32xf32>, vector<16x8xf32> -> vector<16x8xf32>
    %6 = arith.mulf %3, %3 : vector<16x32xf32>
    %cst_4 = arith.constant dense<0.000000e+00> : vector<16xf32>
    %7 = vector.multi_reduction <add>, %6, %cst_4 [1] : vector<16x32xf32> to vector<16xf32>
    %8 = vector.shape_cast %7 : vector<16xf32> to vector<16x1xf32>
    %9 = math.rsqrt %8 : vector<16x1xf32>
    %c0_5 = arith.constant 0 : index
    %c0_6 = arith.constant 0 : index
    %10 = vector.load %arg3[%c0_5, %c0_6] : memref<1x8xf32, #tpu.memory_space<vmem>>, vector<1x8xf32>
    %11 = vector.broadcast %9 : vector<16x1xf32> to vector<16x8xf32>
    %12 = vector.broadcast %10 : vector<1x8xf32> to vector<16x8xf32>
    %13 = arith.mulf %11, %12 : vector<16x8xf32>
    %cst_7 = arith.constant 1.000000e+08 : f32
    %14 = vector.broadcast %cst_7 : f32 to vector<16x8xf32>
    %15 = arith.minimumf %13, %14 : vector<16x8xf32>
    %c0_8 = arith.constant 0 : index
    %c0_9 = arith.constant 0 : index
    %16 = memref.load %arg6[%c0_8, %c0_9] : memref<1x1xf32, #tpu.memory_space<smem>>
    %17 = arith.mulf %5, %15 : vector<16x8xf32>
    %c0_10 = arith.constant 0 : index
    %c0_11 = arith.constant 0 : index
    %18 = vector.load %arg4[%c0_10, %c0_11] : memref<16x8xf32, #tpu.memory_space<vmem>>, vector<16x8xf32>
    %19 = arith.mulf %17, %18 : vector<16x8xf32>
    %20 = vector.shape_cast %19 : vector<16x8xf32> to vector<1x16x8xf32>
    %cst_12 = arith.constant dense<0.000000e+00> : vector<1xf32>
    %21 = vector.multi_reduction <add>, %20, %cst_12 [1, 2] : vector<1x16x8xf32> to vector<1xf32>
    %22 = vector.shape_cast %21 : vector<1xf32> to vector<1x1x1xf32>
    %23 = vector.extract %22[0, 0, 0] : f32 from vector<1x1x1xf32>
    %24 = arith.addf %16, %23 : f32
    %c0_13 = arith.constant 0 : index
    %c0_14 = arith.constant 0 : index
    %25 = memref.load %arg6[%c0_13, %c0_14] : memref<1x1xf32, #tpu.memory_space<smem>>
    memref.store %24, %arg6[%c0_13, %c0_14] : memref<1x1xf32, #tpu.memory_space<smem>>
    %c3_i32 = arith.constant 3 : i32
    %26 = arith.cmpi eq, %arg0, %c3_i32 : i32
    %27 = arith.extui %26 : i1 to i32
    %c0_i32_15 = arith.constant 0 : i32
    %28 = arith.cmpi ne, %27, %c0_i32_15 : i32
    scf.if %28 {
      %c0_16 = arith.constant 0 : index
      %c0_17 = arith.constant 0 : index
      %29 = memref.load %arg6[%c0_16, %c0_17] : memref<1x1xf32, #tpu.memory_space<smem>>
      %cst_18 = arith.constant 0.00223214296 : f32
      %30 = arith.mulf %29, %cst_18 : f32
      %cst_19 = arith.constant 1.000000e+00 : f32
      %31 = arith.subf %30, %cst_19 : f32
      %c0_20 = arith.constant 0 : index
      %c0_21 = arith.constant 0 : index
      %32 = memref.load %arg5[%c0_20, %c0_21] : memref<1x1xf32, #tpu.memory_space<smem>>
      memref.store %31, %arg5[%c0_20, %c0_21] : memref<1x1xf32, #tpu.memory_space<smem>>
    } else {
    }
    return
  }
  func.func @transform_0(%arg0: i32) -> (i32, i32) {
    %c0_i32 = arith.constant 0 : i32
    %c0_i32_0 = arith.constant 0 : i32
    return %arg0, %c0_i32 : i32, i32
  }
  func.func @transform_1(%arg0: i32) -> (i32, i32) {
    %c0_i32 = arith.constant 0 : i32
    %c0_i32_0 = arith.constant 0 : i32
    %c0_i32_1 = arith.constant 0 : i32
    return %c0_i32, %c0_i32_0 : i32, i32
  }
  func.func @transform_2(%arg0: i32) -> (i32, i32) {
    %c0_i32 = arith.constant 0 : i32
    %c0_i32_0 = arith.constant 0 : i32
    %c0_i32_1 = arith.constant 0 : i32
    return %c0_i32, %c0_i32_0 : i32, i32
  }
  func.func @transform_3(%arg0: i32) -> (i32, i32) {
    %c0_i32 = arith.constant 0 : i32
    %c0_i32_0 = arith.constant 0 : i32
    %c0_i32_1 = arith.constant 0 : i32
    return %c0_i32, %c0_i32_0 : i32, i32
  }
  func.func @transform_4(%arg0: i32) -> (i32, i32) {
    %c0_i32 = arith.constant 0 : i32
    %c0_i32_0 = arith.constant 0 : i32
    %c0_i32_1 = arith.constant 0 : i32
    return %c0_i32, %c0_i32_0 : i32, i32
  }
}

</mosaic_0001>

<bundles_post_ra>
// kernel: tpu_custom_call.1
= control target key start
LH: loop header
LB: loop body
LE: loop exit
PB: predicated region body
PF: predicated region fallthrough
CT: control target
= control target key end

     0   :  { %9 = vsyncpa [#allocation4], 0  ;;  %s480_s15 = smov 0   ;;  %s520_s0 = inlined_call_operand.vmem [shape: f32[64,32], index: 0, kind: input, shape index: {}]   ;;  %s521_s1 = inlined_call_operand.vmem [shape: f32[8,32], index: 1, kind: input, shape index: {}]   ;;  %s522_s2 = inlined_call_operand.vmem [shape: f32[1,8], index: 2, kind: input, shape index: {}]   ;;  %s523_s3 = inlined_call_operand.vmem [shape: f32[16,8], index: 3, kind: input, shape index: {}]   ;;  %s524_s4 = inlined_call_operand.hbm [shape: f32[1,1], index: 4, kind: output, shape index: {}]  }
   0x1 LB: > { %s486_s16 = sadd.s32 4294967295, %s451_s15   ;;  %p381_p0 = scmp.ge.s32.totalorder %s451_s15, 1  ;;  %s451_s15 = sphi %s480_s15, %s15_s15  }
   0x2   : > { %p159_p1 = scmp.lt.s32.totalorder %s451_s15, 5 }
   0x4   : > { %p160_p2 = pnand %p381_p0, %p159_p1 }
   0x5   : > { %s382_s19 = sshll.u32 (!%p160_p2), %s486_s16, 1  ;;  %p413_p4 = scmp.eq.s32.totalorder (!%p160_p2), %s486_s16, 0 }
   0x6   : > { %163 = sbr.rel (%p160_p2) target bundleno = 429 (0x1ad), region = 36  ;;  %p181_p3 = scmp.lt.s32.totalorder (!%p160_p2), %s382_s19, 7 }
   0x7   : > { %s453_s30 = smov (!%p160_p2), 0.0   ;;  %p414_p5 = scmp.eq.s32.totalorder (!%p160_p2), %s486_s16, 3 }
   0x8   : > { %s454_s10 = smov (!%p160_p2), [#allocation3]  }
   0xb   : > { %v194_v0 = vld [vmem:[%s521_s1] sm:$0xff]  ;;  %vm195_vm0 = vcmask 261120   ;;  %s526_s19 = smov (!%p181_p3, %s382_s19), 7  ;;  %v305_v16 = vld [vmem:[%s523_s3 + $0x8] sm:$0xff]  ;;  %vm308_vm1 = vcmask 64512   ;;  %406 = sst [smem:[#allocation2]] (%p413_p4), %s453_s30 }
   0xc   : > { %398 = vmatprep.subr.msk.mxu0 %vm195_vm0, %v194_v0  ;;  %s383_s20 = sshll.u32 %s526_s19, 3  ;;  %v388_v10 = vld [vmem:[%s522_s2] ss:$0 sm:$0xff]  ;;  %s301_s5 = sld [smem:[#allocation2]] }
   0xd   : > { %399 = vmatpush3.xpose.msk.msra.mxu0 %vm195_vm0, %v194_v0  ;;  %s184_s23 = scalar_lea.vmem %s520_s0, %s383_s20  ;;  %v304_v20 = vld [vmem:[%s523_s3] sm:$0xff] }
   0xe   : > { %v192_v1 = vld [vmem:[%s184_s23] sm:$0xff]  ;;  %v193_v2 = vld [vmem:[%s184_s23 + $0x8] sm:$0xff] }
   0xf   : > { %400 = vmatprep.mubr.msk.f32.mxu0 %vm195_vm0, %v192_v1  ;;  %v280_v3 = vmul.f32 %v192_v1, %v192_v1  ;;  %v281_v4 = vmul.f32 %v193_v2, %v193_v2 }
  0x10   : > { %401 = vmatmul.mubr.msk.f32.vlgmr.msra.gmra.mxu0 %vm195_vm0, %v193_v2 }
  0x11   : > { %v282_v5 = vsel %vm195_vm0, %v280_v3, 0.0  ;;  %v285_v6 = vsel %vm195_vm0, %v281_v4, 0.0 }
  0x12   : > { %283 = vadd.xlane.f32.xlu0 %v282_v5 }
  0x16   : > { %286 = vadd.xlane.f32.xlu0 %v285_v6 }
  0x9b   : > { %v284_v7 = vpop.xlane.xlu0 %283 }
  0x9f   : > { %v287_v8 = vpop.xlane.xlu0 %286 }
  0xa0   : > { %427 = vrsqrt.f32 %v287_v8 }
  0xa1   : > { %429 = vrsqrt.f32 %v284_v7 }
  0xad   : > { %v428_v9 = vpop.eup %427 }
  0xae   : > { %v298_v11 = vmul.f32 %v428_v9, %v388_v10  ;;  %v430_v12 = vpop.eup %429 }
  0xaf   : > { %v297_v14 = vmul.f32 %v430_v12, %v388_v10 }
  0xb0   : > { %v300_v13 = vmin.f32 %v298_v11, 1e+08 }
  0xb1   : > { %v299_v18 = vmin.f32 %v297_v14, 1e+08 }
  0xd0   : > { %v402_v15 = vpop.f32.mrf.mxu0 }
  0xd1   : > { %v303_v17 = vmul.f32 %v402_v15, %v300_v13 }
  0xd2   : > { %v271_v19 = vpop.f32.mrf.mxu0 }
  0xd3   : > { %v307_v21 = vmul.f32 %v305_v16, %v303_v17  ;;  %v302_v22 = vmul.f32 %v299_v18, %v271_v19 }
  0xd5   : > { %v306_v23 = vmul.f32 %v304_v20, %v302_v22  ;;  %v310_v25 = vsel %vm308_vm1, %v307_v21, 0.0 }
  0xd7   : > { %v309_v24 = vsel %vm308_vm1, %v306_v23, 0.0 }
  0xd8   : > { %v311_v26 = vadd.f32 %v310_v25, %v309_v24 }
  0xda   : > { %312 = vadd.xlane.f32.xlu1 %v311_v26 }
 0x163   : > { %v313_v27 = vpop.xlane.xlu1 %312 }
 0x164   : > { %v314_v28 = vrot.slane %v313_v27, 4 }
 0x166   : > { %v315_v29 = vadd.f32 %v314_v28, %v313_v27 }
 0x168   : > { %v316_v30 = vrot.slane %v315_v29, 2 }
 0x16a   : > { %v317_v31 = vadd.f32 %v316_v30, %v315_v29 }
 0x16c   : > { %v318_v32 = vrot.slane %v317_v31, 1 }
 0x16e   : > { %v319_v33 = vadd.f32 %v318_v32, %v317_v31 }
 0x170   : > { %403 = vpush %v319_v33 }
 0x1a1   : > { %s404_s6 = spop %403 }
 0x1a2   : > { %s321_s7 = sadd.f32 %s404_s6, %s301_s5 }
 0x1a4   : > { %323 = sst [smem:[#allocation2]] %s321_s7  ;;  %s329_s8 = smul.f32 0.002232143, %s321_s7 }
 0x1a6   : > { %s390_s9 = sadd.f32 -1.0, %s329_s8 }
 0x1a8   : > { %408 = sst [smem:[#allocation3]] (%p414_p5), %s390_s9 }
 0x1a9   : > { %410 = dma.smem_to_hbm (%p414_p5), %s454_s10, 16, %s524_s4, [#allocation4]  }
 0x1aa   : > { %446 = dma.done.wait (%p414_p5), [#allocation4], 16  }
 0x1ab   : > { %448 = vsyncadd (%p414_p5), [#allocation4], 4294967280 }
 0x1ac   : > { %346 = sfence }
 0x1ad PF: > { %s15_s15 = sadd.s32 1, %s451_s15  }
 0x1ae   : > { %p12_p6 = scmp.ge.s32.totalorder %s15_s15, 6  }
 0x1b0   :  { %14 = sbr.rel (!%p12_p6) target bundleno = 1 (0x1), region = 74 }
 0x1b5   :  { %352 = vsyncpa [#allocation4], 1 }
 0x1b6   :  { %354 = vsyncpa [#allocation4 + $0x1], 1 }

</bundles_post_ra>
